<compile_context>
chip_gen: v5e
topology: v5e:2x2
jax: 0.10.0
libtpu: 0.0.40
codegen_flags: <defaults>
</compile_context>

<pallas_src>
import jax
import jax.numpy as jnp
from jax.experimental import pallas as pl
from jax.experimental.pallas import tpu as pltpu

EPS = 1e-07


# --------------------------------------------------------------------------
# Kernels: operate on a (TR, TC) tile of entities and a (TR, 1) mask column
# that broadcasts across the lane (C) axis.
# --------------------------------------------------------------------------
def _mask_mult_kernel(ent_ref, mask_ref, out_ref):
    out_ref[...] = (ent_ref[...] * mask_ref[...]).astype(out_ref.dtype)


def _mask_logsum_kernel(ent_ref, logm_ref, out_ref):
    # logm_ref is float32; the add promotes bf16 entities to f32 before the
    # final cast back to the output dtype.
    out_ref[...] = (ent_ref[...] + logm_ref[...]).astype(out_ref.dtype)


# --------------------------------------------------------------------------
# Tile sizing: big, lane-dense, VMEM-budgeted blocks.
# --------------------------------------------------------------------------
def _choose_tiles(R, C, itemsize, target_block_bytes=2 * 1024 * 1024):
    # Lane (last-dim) tile: multiple of 128, or the full C when C is not
    # 128-aligned (full-extent blocks are always legal).
    if C % 128 == 0:
        TC = min(C, 2048)
    else:
        TC = C
    row_bytes = max(1, TC * itemsize)
    TR = target_block_bytes // row_bytes
    TR = max(8, (TR // 8) * 8)          # sublane multiple of 8
    if TR >= R:
        TR = R                          # full extent is always legal
    return TR, TC


# --------------------------------------------------------------------------
# Wrapper
# --------------------------------------------------------------------------
def entity_masker(entities, mask, mode="multiplicative"):
    """entities: (B, M, C) float, mask: (B, M) float -> (B, M, C)."""
    assert mode in ("multiplicative", "logsum")
    assert mask.shape[:2] == entities.shape[:2]
    B, M, C = entities.shape
    R = B * M

    ent2d = entities.reshape(R, C)
    if mode == "multiplicative":
        m2d = mask.reshape(R, 1).astype(entities.dtype)
        kernel = _mask_mult_kernel
    else:
        # Precompute the log in float32 in the wrapper (tiny array), so the
        # kernel body is a pure broadcast-add and precision is preserved for
        # low-precision entity dtypes.
        logm = jnp.log(jnp.clip(mask.astype(jnp.float32), 0.0, None) + EPS)
        m2d = logm.reshape(R, 1)
        kernel = _mask_logsum_kernel

    itemsize = jnp.dtype(entities.dtype).itemsize
    TR, TC = _choose_tiles(R, C, itemsize)
    grid = (pl.cdiv(R, TR), pl.cdiv(C, TC))

    bytes_accessed = 2 * R * C * itemsize + R * jnp.dtype(m2d.dtype).itemsize

    out2d = pl.pallas_call(
        kernel,
        out_shape=jax.ShapeDtypeStruct((R, C), entities.dtype),
        grid_spec=pltpu.PrefetchScalarGridSpec(
            num_scalar_prefetch=0,
            grid=grid,
            in_specs=[
                pl.BlockSpec((TR, TC), lambda i, j: (i, j)),
                pl.BlockSpec((TR, 1), lambda i, j: (i, 0)),
            ],
            out_specs=pl.BlockSpec((TR, TC), lambda i, j: (i, j)),
        ),
        compiler_params=pltpu.CompilerParams(
            dimension_semantics=("parallel", "parallel"),
            vmem_limit_bytes=32 * 1024 * 1024,
        ),
        cost_estimate=pl.CostEstimate(
            flops=R * C,
            transcendentals=0,
            bytes_accessed=bytes_accessed,
        ),
    )(ent2d, m2d)

    return out2d.reshape(B, M, C)


# --------------------------------------------------------------------------
# Pure-JAX reference (mirrors the PyTorch module)
# --------------------------------------------------------------------------
def _ref_entity_masker(entities, mask, mode):
    if mode == "multiplicative":
        return entities * mask[:, :, None]
    else:
        log_mask = jnp.log(jnp.clip(mask, 0.0, None) + EPS)
        return entities + log_mask[:, :, None]


if __name__ == "__main__":
    key = jax.random.PRNGKey(0)
    k1, k2 = jax.random.split(key)

    B, M, C = 2, 8, 32  # batch=2, entities(seq)=8, hidden=32
    entities = jax.random.normal(k1, (B, M, C), dtype=jnp.float32)
    # mask in [0, 1), include some exact zeros to exercise clamp/eps path
    mask = jax.random.uniform(k2, (B, M), dtype=jnp.float32)
    mask = mask.at[0, 0].set(0.0).at[1, 3].set(0.0)

    ok = True
    for mode in ("multiplicative", "logsum"):
        out = entity_masker(entities, mask, mode=mode)
        out = jax.block_until_ready(out)
        ref = _ref_entity_masker(entities, mask, mode)
        if not jnp.allclose(out, ref, atol=1e-5, rtol=1e-5):
            ok = False
            print(f"MISMATCH in mode={mode}")

    if ok:
        print("KERNEL_OK")
</pallas_src>

<mosaic_0001>
module attributes {stable_mosaic.version = 11 : i64} {
  func.func @_mask_mult_kernel(%arg0: i32, %arg1: i32, %arg2: memref<16x32xf32, #tpu.memory_space<vmem>>, %arg3: memref<16x1xf32, #tpu.memory_space<vmem>>, %arg4: memref<16x32xf32, #tpu.memory_space<vmem>>) attributes {dimension_semantics = [#tpu.dimension_semantics<parallel>, #tpu.dimension_semantics<parallel>], iteration_bounds = array<i64: 1, 1>, scalar_prefetch = 0 : i64, scratch_operands = 0 : i64, tpu.core_type = #tpu.core_type<tc>, window_params = [{transform_indices = @transform_0, window_bounds = array<i64: 16, 32>}, {transform_indices = @transform_1, window_bounds = array<i64: 16, 1>}, {transform_indices = @transform_2, window_bounds = array<i64: 16, 32>}]} {
    %c0 = arith.constant 0 : index
    %c0_0 = arith.constant 0 : index
    %0 = vector.load %arg2[%c0, %c0_0] : memref<16x32xf32, #tpu.memory_space<vmem>>, vector<16x32xf32>
    %c0_1 = arith.constant 0 : index
    %c0_2 = arith.constant 0 : index
    %1 = vector.load %arg3[%c0_1, %c0_2] : memref<16x1xf32, #tpu.memory_space<vmem>>, vector<16x1xf32>
    %2 = vector.broadcast %1 : vector<16x1xf32> to vector<16x32xf32>
    %3 = arith.mulf %0, %2 : vector<16x32xf32>
    %c0_3 = arith.constant 0 : index
    %c0_4 = arith.constant 0 : index
    %4 = vector.load %arg4[%c0_3, %c0_4] : memref<16x32xf32, #tpu.memory_space<vmem>>, vector<16x32xf32>
    tpu.vector_store %arg4[%c0_3, %c0_4], %3 {strides = array<i32>} : memref<16x32xf32, #tpu.memory_space<vmem>>, vector<16x32xf32>,
    return
  }
  func.func @transform_0(%arg0: i32, %arg1: i32) -> (i32, i32) {
    %c0_i32 = arith.constant 0 : i32
    return %arg0, %arg1 : i32, i32
  }
  func.func @transform_1(%arg0: i32, %arg1: i32) -> (i32, i32) {
    %c0_i32 = arith.constant 0 : i32
    %c0_i32_0 = arith.constant 0 : i32
    return %arg0, %c0_i32 : i32, i32
  }
  func.func @transform_2(%arg0: i32, %arg1: i32) -> (i32, i32) {
    %c0_i32 = arith.constant 0 : i32
    return %arg0, %arg1 : i32, i32
  }
}

</mosaic_0001>

<bundles_post_ra>
// kernel: tpu_custom_call.1
= control target key start
LH: loop header
LB: loop body
LE: loop exit
PB: predicated region body
PF: predicated region fallthrough
CT: control target
= control target key end

     0   :  { %s114_s0 = inlined_call_operand.vmem [shape: f32[16,32], index: 0, kind: input, shape index: {}]   ;;  %s115_s1 = inlined_call_operand.vmem [shape: f32[16,1], index: 1, kind: input, shape index: {}]   ;;  %s116_s2 = inlined_call_operand.hbm [shape: f32[16,32], index: 2, kind: output, shape index: {}]  }
   0x1   :  { %v14_v0 = vld [vmem:[%s115_s1] sm:$0xff] }
   0x2   :  { %7 = vsyncpa [#allocation3], 0  ;;  %v80_v1 = vmov 0   ;;  %v15_v2 = vld [vmem:[%s115_s1 + $0x8] sm:$0xff]  ;;  %v12_v3 = vld [vmem:[%s114_s0] sm:$0xff]  ;;  %vm28_vm0 = vcmask 261120  }
   0x3   :  { %53 = vset.pattern.permute.xlu0 %v80_v1  ;;  %s81_s15 = smov [#allocation2]   ;;  %s37_s19 = sshll.u32 %s116_s2, 4  ;;  %v13_v6 = vld [vmem:[%s114_s0 + $0x8] sm:$0xff]  ;;  %s38_s19 = int_to_ptr.hbm [resolvable:$true] %s37_s19 }
   0x4   :  { %18 = vperm.xlu0 %53, %v14_v0   ;;  %s35_s16 = sshll.u32 %s81_s15, 4  ;;  %s82_s1 = smov 128   ;;  %s36_s16 = int_to_ptr.vmem [resolvable:$true] %s35_s16 }
   0x5   :  { %s83_s22 = smov 8  }
   0xc   :  { %23 = vperm.xlu0 %53, %v15_v2  }
  0x76   :  { %v19_v4 = vpop.permute.xlu0 %18 }
  0x77   :  { %v26_v5 = vmul.f32 %v19_v4, %v12_v3 }
  0x79   :  { %29 = vst.msk [vmem:[#allocation2] sm:$0xff] %vm28_vm0, %v26_v5 }
  0x7e   :  { %v24_v7 = vpop.permute.xlu0 %23 }
  0x7f   :  { %v27_v8 = vmul.f32 %v24_v7, %v13_v6 }
  0x81   :  { %30 = vst.msk [vmem:[#allocation2 + $0x8] sm:$0xff] %vm28_vm0, %v27_v8 }
  0x82   :  { %43 = dma.vmem_to_hbm [thread:$0]  %s36_s16, 256, %s38_s19, [#allocation3], %s82_s1, %s82_s1, %s83_s22  }
  0x83   :  { %78 = dma.done.wait [#allocation3], 256  }
  0x84   :  { %79 = vsyncadd [#allocation3], 4294967040 }
  0x85   :  { %48 = vsyncpa [#allocation3], 1 }

</bundles_post_ra>
